<compile_context>
chip_gen: v7x
topology: tpu7x:2x2x1
jax: 0.10.0
libtpu: 0.0.40
codegen_flags: <defaults>
</compile_context>

<pallas_src>
import functools

import numpy as np
import jax
import jax.numpy as jnp
from jax.experimental import pallas as pl
from jax.experimental.pallas import tpu as pltpu


_LANE = 128
_SUBLANE = 8
# Explicit scoped-VMEM request: above the 32 MiB default, safely inside the
# 64 MiB physical VMEM of v7x (v5e / v6e have 128 MiB).
_VMEM_LIMIT_BYTES = 48 * 1024 * 1024
# Budget used when deriving the batch tile (headroom left for compiler scratch).
_TILE_VMEM_BUDGET = 32 * 1024 * 1024


def _round_up(n, m):
    return ((n + m - 1) // m) * m


def _choose_row_tile(batch, n_views, k, d, h, o):
    """Largest multiple-of-8 batch tile whose double-buffered working set fits."""
    # Resident weights (counted double-buffered to be conservative).
    fixed = 2 * (k * d * 2 + d * h * 2 + h * o * 2 + h * 4 + o * 4)
    # Per output row: n_views bf16 x-tiles + f32 additive term + n_views f32 out
    # rows, all double-buffered by the pipeline.
    per_row = 2 * (n_views * k * 2 + d * 4 + n_views * o * 4)
    tile = (_TILE_VMEM_BUDGET - fixed) // max(per_row, 1)
    tile = max(_SUBLANE, min(int(tile), 512))
    tile = (tile // _SUBLANE) * _SUBLANE
    # Never pad a small batch past the next multiple of 8.
    return min(tile, _round_up(batch, _SUBLANE))


# ----------------------------------------------------------------------------
# Fused per-group kernel: backbone (GAP folded into matmul) + DINO-head MLP
# ----------------------------------------------------------------------------
def _group_kernel(*refs, n_views):
    """refs = (x_view_0..x_view_{V-1},  # (TB, C*HW) bf16
               add,                     # (TB, D)    f32  backbone bias + covariate emb
               w_exp,                   # (C*HW, D)  bf16 repeat(W/HW): GAP fused in K
               w1, b1, w2, b2,          # head params (bf16 weights, f32 biases)
               out)                     # (V, TB, O) f32
    """
    x_refs = refs[:n_views]
    add_ref, wexp_ref, w1_ref, b1_ref, w2_ref, b2_ref, out_ref = refs[n_views:]

    add = add_ref[...]            # loaded once per grid step, shared by all views
    wexp = wexp_ref[...]
    w1 = w1_ref[...]
    b1 = b1_ref[...]
    w2 = w2_ref[...]
    b2 = b2_ref[...]

    for v in range(n_views):
        # Backbone: fused spatial-mean + projection, K = C*HW feeds the MXU.
        feat = jnp.dot(x_refs[v][...], wexp,
                       preferred_element_type=jnp.float32) + add        # (TB, D) f32
        # Head MLP: bf16 MXU operands, f32 accumulation, f32 GELU (EUP).
        hid = jnp.dot(feat.astype(jnp.bfloat16), w1,
                      preferred_element_type=jnp.float32) + b1           # (TB, H)
        hid = jax.nn.gelu(hid)
        out_ref[v] = jnp.dot(hid.astype(jnp.bfloat16), w2,
                             preferred_element_type=jnp.float32) + b2    # (TB, O)


def _group_forward(x_views, add, w_exp, w1, b1, w2, b2, row_tile):
    n_views = len(x_views)
    bp, k = x_views[0].shape
    d = w_exp.shape[1]
    h = w1.shape[1]
    o = w2.shape[1]
    n_tiles = bp // row_tile

    def row_map(j):
        return (j, 0)

    def const_map(j):
        return (0, 0)

    in_specs = (
        [pl.BlockSpec((row_tile, k), row_map) for _ in range(n_views)]
        + [
            pl.BlockSpec((row_tile, d), row_map),   # add (bias + covariate emb)
            pl.BlockSpec((k, d), const_map),        # w_exp
            pl.BlockSpec((d, h), const_map),        # w1
            pl.BlockSpec((1, h), const_map),        # b1
            pl.BlockSpec((h, o), const_map),        # w2
            pl.BlockSpec((1, o), const_map),        # b2
        ]
    )
    out_spec = pl.BlockSpec((n_views, row_tile, o), lambda j: (0, j, 0))

    return pl.pallas_call(
        functools.partial(_group_kernel, n_views=n_views),
        out_shape=jax.ShapeDtypeStruct((n_views, bp, o), jnp.float32),
        grid=(n_tiles,),
        in_specs=in_specs,
        out_specs=out_spec,
        compiler_params=pltpu.CompilerParams(
            dimension_semantics=("parallel",),
            vmem_limit_bytes=_VMEM_LIMIT_BYTES,
        ),
    )(*x_views, add, w_exp, w1, b1, w2, b2)


# ----------------------------------------------------------------------------
# MultiCropWrapper forward (grouping / covariate logic is glue, compute is Pallas)
# ----------------------------------------------------------------------------
def multi_crop_wrapper_forward(x, extra_tokens, params):
    if not isinstance(x, (list, tuple)):
        x = [x]

    # torch.cumsum(torch.unique_consecutive([inp.shape[-1]], return_counts=True)[1], 0)
    sizes = [int(inp.shape[-1]) for inp in x]
    counts = []
    prev = None
    for s in sizes:
        if prev is not None and s == prev:
            counts[-1] += 1
        else:
            counts.append(1)
        prev = s
    idx_crops = np.cumsum(counts)

    b = int(x[0].shape[0])
    d = params["w_bb"].shape[1]
    h = params["w1"].shape[1]
    o = params["w2"].shape[1]
    # Lane-dense feature / head dims keep output stores unmasked full-lane vst.
    assert d % _LANE == 0 and h % _LANE == 0 and o % _LANE == 0, (
        "embed/head dims must be multiples of 128")
    # TODO(synk): pad D/H/O internally if a non-multiple-of-128 head is required.
    # TODO(synk): channel_drop > 0 (nn.Dropout2d) path not implemented; the
    #             module default channel_drop=0.0 -> nn.Identity is what runs here.

    # Covariate handling (_repeat_extra_tokens): every view of a group shares the
    # base-batch covariates, so fold embedding + backbone bias into one (B, D)
    # additive term once instead of materialising a per-view repeat.
    ch_idx = extra_tokens["channels"]
    add = (params["emb"][ch_idx] + params["b_bb"]).astype(jnp.float32)   # (B, D)

    w1 = params["w1"].astype(jnp.bfloat16)
    b1 = params["b1"].astype(jnp.float32)
    w2 = params["w2"].astype(jnp.bfloat16)
    b2 = params["b2"].astype(jnp.float32)

    w_exp_cache = {}
    outputs = []
    start_idx = 0
    for end_idx in idx_crops:
        views = x[start_idx:end_idx]
        n_views = len(views)
        c, hgt, wid = views[0].shape[1:]
        hw = hgt * wid
        k = c * hw

        # GAP folded into the projection: W_exp[c*HW + s, :] = w_bb[c, :] / HW.
        if hw not in w_exp_cache:
            w_exp_cache[hw] = (
                jnp.repeat(params["w_bb"], hw, axis=0) / float(hw)
            ).astype(jnp.bfloat16)
        w_exp = w_exp_cache[hw]

        row_tile = _choose_row_tile(b, n_views, k, d, h, o)
        bp = _round_up(b, row_tile)
        pad = bp - b

        # Views are fed unconcatenated; reshape of a contiguous NCHW tensor is
        # cheap, bf16 halves the HBM traffic, row padding is a no-op when the
        # base batch is already a multiple of the tile.
        x_views = [
            jnp.pad(v.reshape(b, k).astype(jnp.bfloat16), ((0, pad), (0, 0)))
            for v in views
        ]
        add_p = jnp.pad(add, ((0, pad), (0, 0)))

        out_g = _group_forward(x_views, add_p, w_exp, w1, b1, w2, b2, row_tile)
        # (V, Bp, O) -> drop row padding -> (V*B, O); matches torch.cat order.
        outputs.append(out_g[:, :b, :].reshape(n_views * b, o))
        start_idx = end_idx

    return outputs[0] if len(outputs) == 1 else jnp.concatenate(outputs, axis=0)


# ----------------------------------------------------------------------------
# Pure-JAX f32 reference (mirrors the PyTorch module)
# ----------------------------------------------------------------------------
def _reference_forward(x, extra_tokens, params):
    if not isinstance(x, (list, tuple)):
        x = [x]
    sizes = [int(inp.shape[-1]) for inp in x]
    counts = []
    prev = None
    for s in sizes:
        if prev is not None and s == prev:
            counts[-1] += 1
        else:
            counts.append(1)
        prev = s
    idx_crops = np.cumsum(counts)

    feats = []
    start = 0
    for end in idx_crops:
        xg = jnp.concatenate(x[start:end], axis=0)                      # (V*B, C, H, W)
        pooled = jnp.mean(xg.reshape(xg.shape[0], xg.shape[1], -1), axis=-1)
        ch = jnp.tile(extra_tokens["channels"], end - start)
        feats.append(pooled @ params["w_bb"] + params["b_bb"] + params["emb"][ch])
        start = end
    feats = jnp.concatenate(feats, axis=0)
    hid = jax.nn.gelu(feats @ params["w1"] + params["b1"])
    return hid @ params["w2"] + params["b2"]


# ----------------------------------------------------------------------------
# Demo
# ----------------------------------------------------------------------------
if __name__ == "__main__":
    key = jax.random.PRNGKey(0)
    B, C = 2, 4                  # batch per crop, channels
    D, H, O = 128, 256, 128      # lane-dense embed dim, head hidden, head out
    N_IDS = 8                    # covariate ids for the embedding table

    keys = jax.random.split(key, 11)
    params = {
        "w_bb": jax.random.normal(keys[0], (C, D), jnp.float32) * 0.1,
        "b_bb": jax.random.normal(keys[1], (1, D), jnp.float32) * 0.01,
        "emb":  jax.random.normal(keys[2], (N_IDS, D), jnp.float32) * 0.1,
        "w1":   jax.random.normal(keys[3], (D, H), jnp.float32) * 0.1,
        "b1":   jax.random.normal(keys[4], (1, H), jnp.float32) * 0.01,
        "w2":   jax.random.normal(keys[5], (H, O), jnp.float32) * 0.1,
        "b2":   jax.random.normal(keys[6], (1, O), jnp.float32) * 0.01,
    }

    # Multi-crop input: 2 global crops @ 16x16, 2 local crops @ 8x8 (NCHW).
    g1 = jax.random.normal(keys[7], (B, C, 16, 16), jnp.float32)
    g2 = jax.random.normal(keys[8], (B, C, 16, 16), jnp.float32)
    l1 = jax.random.normal(keys[9], (B, C, 8, 8), jnp.float32)
    l2 = jax.random.normal(keys[10], (B, C, 8, 8), jnp.float32)
    x = [g1, g2, l1, l2]

    # extra_tokens: one 1-D covariate per sample in the base batch.
    extra_tokens = {"channels": jnp.array([1, 3], dtype=jnp.int32)}

    out = multi_crop_wrapper_forward(x, extra_tokens, params)
    out = jax.block_until_ready(out)
    assert out.shape == (4 * B, O), out.shape
    assert bool(jnp.all(jnp.isfinite(out)))

    ref = _reference_forward(x, extra_tokens, params)
    np.testing.assert_allclose(np.asarray(out), np.asarray(ref), atol=2e-2, rtol=0)

    print("KERNEL_OK")
</pallas_src>

<mosaic_0001>
module attributes {stable_mosaic.version = 11 : i64} {
  func.func @_group_kernel(%arg0: i32, %arg1: memref<8x1024xbf16, #tpu.memory_space<vmem>>, %arg2: memref<8x1024xbf16, #tpu.memory_space<vmem>>, %arg3: memref<8x128xf32, #tpu.memory_space<vmem>>, %arg4: memref<1024x128xbf16, #tpu.memory_space<vmem>>, %arg5: memref<128x256xbf16, #tpu.memory_space<vmem>>, %arg6: memref<1x256xf32, #tpu.memory_space<vmem>>, %arg7: memref<256x128xbf16, #tpu.memory_space<vmem>>, %arg8: memref<1x128xf32, #tpu.memory_space<vmem>>, %arg9: memref<2x8x128xf32, #tpu.memory_space<vmem>>) attributes {dimension_semantics = [#tpu.dimension_semantics<parallel>], iteration_bounds = array<i64: 1>, scalar_prefetch = 0 : i64, scratch_operands = 0 : i64, tpu.core_type = #tpu.core_type<tc>, window_params = [{transform_indices = @transform_0, window_bounds = array<i64: 8, 1024>}, {transform_indices = @transform_1, window_bounds = array<i64: 8, 1024>}, {transform_indices = @transform_2, window_bounds = array<i64: 8, 128>}, {pipeline_mode = #tpu.pipeline_mode<synchronous>, transform_indices = @transform_3, window_bounds = array<i64: 1024, 128>}, {pipeline_mode = #tpu.pipeline_mode<synchronous>, transform_indices = @transform_4, window_bounds = array<i64: 128, 256>}, {pipeline_mode = #tpu.pipeline_mode<synchronous>, transform_indices = @transform_5, window_bounds = array<i64: 1, 256>}, {pipeline_mode = #tpu.pipeline_mode<synchronous>, transform_indices = @transform_6, window_bounds = array<i64: 256, 128>}, {pipeline_mode = #tpu.pipeline_mode<synchronous>, transform_indices = @transform_7, window_bounds = array<i64: 1, 128>}, {transform_indices = @transform_8, window_bounds = array<i64: 2, 8, 128>}]} {
    %c0 = arith.constant 0 : index
    %c0_0 = arith.constant 0 : index
    %0 = vector.load %arg3[%c0, %c0_0] : memref<8x128xf32, #tpu.memory_space<vmem>>, vector<8x128xf32>
    %c0_1 = arith.constant 0 : index
    %c0_2 = arith.constant 0 : index
    %1 = vector.load %arg4[%c0_1, %c0_2] : memref<1024x128xbf16, #tpu.memory_space<vmem>>, vector<1024x128xbf16>
    %c0_3 = arith.constant 0 : index
    %c0_4 = arith.constant 0 : index
    %2 = vector.load %arg5[%c0_3, %c0_4] : memref<128x256xbf16, #tpu.memory_space<vmem>>, vector<128x256xbf16>
    %c0_5 = arith.constant 0 : index
    %c0_6 = arith.constant 0 : index
    %3 = vector.load %arg6[%c0_5, %c0_6] : memref<1x256xf32, #tpu.memory_space<vmem>>, vector<1x256xf32>
    %c0_7 = arith.constant 0 : index
    %c0_8 = arith.constant 0 : index
    %4 = vector.load %arg7[%c0_7, %c0_8] : memref<256x128xbf16, #tpu.memory_space<vmem>>, vector<256x128xbf16>
    %c0_9 = arith.constant 0 : index
    %c0_10 = arith.constant 0 : index
    %5 = vector.load %arg8[%c0_9, %c0_10] : memref<1x128xf32, #tpu.memory_space<vmem>>, vector<1x128xf32>
    %c0_11 = arith.constant 0 : index
    %c0_12 = arith.constant 0 : index
    %6 = vector.load %arg1[%c0_11, %c0_12] : memref<8x1024xbf16, #tpu.memory_space<vmem>>, vector<8x1024xbf16>
    %cst = arith.constant dense<0.000000e+00> : vector<8x128xf32>
    %7 = tpu.matmul %6, %1, %cst {dimension_numbers = #tpu.dot_dimension_numbers<[1], [0], [0], [1], [0, 0, 1, 1], [], []>} : vector<8x1024xbf16>, vector<1024x128xbf16>, vector<8x128xf32> -> vector<8x128xf32>
    %8 = arith.addf %7, %0 : vector<8x128xf32>
    %9 = arith.truncf %8 : vector<8x128xf32> to vector<8x128xbf16>
    %cst_13 = arith.constant dense<0.000000e+00> : vector<8x256xf32>
    %10 = tpu.matmul %9, %2, %cst_13 {dimension_numbers = #tpu.dot_dimension_numbers<[1], [0], [0], [1], [0, 0, 1, 1], [], []>} : vector<8x128xbf16>, vector<128x256xbf16>, vector<8x256xf32> -> vector<8x256xf32>
    %11 = vector.broadcast %3 : vector<1x256xf32> to vector<8x256xf32>
    %12 = arith.addf %10, %11 : vector<8x256xf32>
    %13 = arith.mulf %12, %12 : vector<8x256xf32>
    %14 = arith.mulf %12, %13 : vector<8x256xf32>
    %cst_14 = arith.constant 4.471500e-02 : f32
    %15 = vector.broadcast %cst_14 : f32 to vector<8x256xf32>
    %16 = arith.mulf %15, %14 : vector<8x256xf32>
    %17 = arith.addf %12, %16 : vector<8x256xf32>
    %cst_15 = arith.constant 0.797884583 : f32
    %18 = vector.broadcast %cst_15 : f32 to vector<8x256xf32>
    %19 = arith.mulf %18, %17 : vector<8x256xf32>
    %20 = math.tanh %19 : vector<8x256xf32>
    %cst_16 = arith.constant 1.000000e+00 : f32
    %21 = vector.broadcast %cst_16 : f32 to vector<8x256xf32>
    %22 = arith.addf %21, %20 : vector<8x256xf32>
    %cst_17 = arith.constant 5.000000e-01 : f32
    %23 = vector.broadcast %cst_17 : f32 to vector<8x256xf32>
    %24 = arith.mulf %23, %22 : vector<8x256xf32>
    %25 = arith.mulf %12, %24 : vector<8x256xf32>
    %26 = arith.truncf %25 : vector<8x256xf32> to vector<8x256xbf16>
    %cst_18 = arith.constant dense<0.000000e+00> : vector<8x128xf32>
    %27 = tpu.matmul %26, %4, %cst_18 {dimension_numbers = #tpu.dot_dimension_numbers<[1], [0], [0], [1], [0, 0, 1, 1], [], []>} : vector<8x256xbf16>, vector<256x128xbf16>, vector<8x128xf32> -> vector<8x128xf32>
    %28 = vector.broadcast %5 : vector<1x128xf32> to vector<8x128xf32>
    %29 = arith.addf %27, %28 : vector<8x128xf32>
    %c0_19 = arith.constant 0 : index
    %c0_20 = arith.constant 0 : index
    %c0_21 = arith.constant 0 : index
    %30 = vector.load %arg9[%c0_19, %c0_20, %c0_21] : memref<2x8x128xf32, #tpu.memory_space<vmem>>, vector<1x8x128xf32>
    %31 = vector.shape_cast %30 : vector<1x8x128xf32> to vector<8x128xf32>
    %32 = vector.shape_cast %29 : vector<8x128xf32> to vector<1x8x128xf32>
    tpu.vector_store %arg9[%c0_19, %c0_20, %c0_21], %32 {strides = array<i32>} : memref<2x8x128xf32, #tpu.memory_space<vmem>>, vector<1x8x128xf32>,
    %c0_22 = arith.constant 0 : index
    %c0_23 = arith.constant 0 : index
    %33 = vector.load %arg2[%c0_22, %c0_23] : memref<8x1024xbf16, #tpu.memory_space<vmem>>, vector<8x1024xbf16>
    %cst_24 = arith.constant dense<0.000000e+00> : vector<8x128xf32>
    %34 = tpu.matmul %33, %1, %cst_24 {dimension_numbers = #tpu.dot_dimension_numbers<[1], [0], [0], [1], [0, 0, 1, 1], [], []>} : vector<8x1024xbf16>, vector<1024x128xbf16>, vector<8x128xf32> -> vector<8x128xf32>
    %35 = arith.addf %34, %0 : vector<8x128xf32>
    %36 = arith.truncf %35 : vector<8x128xf32> to vector<8x128xbf16>
    %cst_25 = arith.constant dense<0.000000e+00> : vector<8x256xf32>
    %37 = tpu.matmul %36, %2, %cst_25 {dimension_numbers = #tpu.dot_dimension_numbers<[1], [0], [0], [1], [0, 0, 1, 1], [], []>} : vector<8x128xbf16>, vector<128x256xbf16>, vector<8x256xf32> -> vector<8x256xf32>
    %38 = vector.broadcast %3 : vector<1x256xf32> to vector<8x256xf32>
    %39 = arith.addf %37, %38 : vector<8x256xf32>
    %40 = arith.mulf %39, %39 : vector<8x256xf32>
    %41 = arith.mulf %39, %40 : vector<8x256xf32>
    %cst_26 = arith.constant 4.471500e-02 : f32
    %42 = vector.broadcast %cst_26 : f32 to vector<8x256xf32>
    %43 = arith.mulf %42, %41 : vector<8x256xf32>
    %44 = arith.addf %39, %43 : vector<8x256xf32>
    %cst_27 = arith.constant 0.797884583 : f32
    %45 = vector.broadcast %cst_27 : f32 to vector<8x256xf32>
    %46 = arith.mulf %45, %44 : vector<8x256xf32>
    %47 = math.tanh %46 : vector<8x256xf32>
    %cst_28 = arith.constant 1.000000e+00 : f32
    %48 = vector.broadcast %cst_28 : f32 to vector<8x256xf32>
    %49 = arith.addf %48, %47 : vector<8x256xf32>
    %cst_29 = arith.constant 5.000000e-01 : f32
    %50 = vector.broadcast %cst_29 : f32 to vector<8x256xf32>
    %51 = arith.mulf %50, %49 : vector<8x256xf32>
    %52 = arith.mulf %39, %51 : vector<8x256xf32>
    %53 = arith.truncf %52 : vector<8x256xf32> to vector<8x256xbf16>
    %cst_30 = arith.constant dense<0.000000e+00> : vector<8x128xf32>
    %54 = tpu.matmul %53, %4, %cst_30 {dimension_numbers = #tpu.dot_dimension_numbers<[1], [0], [0], [1], [0, 0, 1, 1], [], []>} : vector<8x256xbf16>, vector<256x128xbf16>, vector<8x128xf32> -> vector<8x128xf32>
    %55 = vector.broadcast %5 : vector<1x128xf32> to vector<8x128xf32>
    %56 = arith.addf %54, %55 : vector<8x128xf32>
    %c1 = arith.constant 1 : index
    %c0_31 = arith.constant 0 : index
    %c0_32 = arith.constant 0 : index
    %57 = vector.load %arg9[%c1, %c0_31, %c0_32] : memref<2x8x128xf32, #tpu.memory_space<vmem>>, vector<1x8x128xf32>
    %58 = vector.shape_cast %57 : vector<1x8x128xf32> to vector<8x128xf32>
    %59 = vector.shape_cast %56 : vector<8x128xf32> to vector<1x8x128xf32>
    tpu.vector_store %arg9[%c1, %c0_31, %c0_32], %59 {strides = array<i32>} : memref<2x8x128xf32, #tpu.memory_space<vmem>>, vector<1x8x128xf32>,
    return
  }
  func.func @transform_0(%arg0: i32) -> (i32, i32) {
    %c0_i32 = arith.constant 0 : i32
    %c0_i32_0 = arith.constant 0 : i32
    return %arg0, %c0_i32 : i32, i32
  }
  func.func @transform_1(%arg0: i32) -> (i32, i32) {
    %c0_i32 = arith.constant 0 : i32
    %c0_i32_0 = arith.constant 0 : i32
    return %arg0, %c0_i32 : i32, i32
  }
  func.func @transform_2(%arg0: i32) -> (i32, i32) {
    %c0_i32 = arith.constant 0 : i32
    %c0_i32_0 = arith.constant 0 : i32
    return %arg0, %c0_i32 : i32, i32
  }
  func.func @transform_3(%arg0: i32) -> (i32, i32) {
    %c0_i32 = arith.constant 0 : i32
    %c0_i32_0 = arith.constant 0 : i32
    %c0_i32_1 = arith.constant 0 : i32
    return %c0_i32, %c0_i32_0 : i32, i32
  }
  func.func @transform_4(%arg0: i32) -> (i32, i32) {
    %c0_i32 = arith.constant 0 : i32
    %c0_i32_0 = arith.constant 0 : i32
    %c0_i32_1 = arith.constant 0 : i32
    return %c0_i32, %c0_i32_0 : i32, i32
  }
  func.func @transform_5(%arg0: i32) -> (i32, i32) {
    %c0_i32 = arith.constant 0 : i32
    %c0_i32_0 = arith.constant 0 : i32
    %c0_i32_1 = arith.constant 0 : i32
    return %c0_i32, %c0_i32_0 : i32, i32
  }
  func.func @transform_6(%arg0: i32) -> (i32, i32) {
    %c0_i32 = arith.constant 0 : i32
    %c0_i32_0 = arith.constant 0 : i32
    %c0_i32_1 = arith.constant 0 : i32
    return %c0_i32, %c0_i32_0 : i32, i32
  }
  func.func @transform_7(%arg0: i32) -> (i32, i32) {
    %c0_i32 = arith.constant 0 : i32
    %c0_i32_0 = arith.constant 0 : i32
    %c0_i32_1 = arith.constant 0 : i32
    return %c0_i32, %c0_i32_0 : i32, i32
  }
  func.func @transform_8(%arg0: i32) -> (i32, i32, i32) {
    %c0_i32 = arith.constant 0 : i32
    %c0_i32_0 = arith.constant 0 : i32
    %c0_i32_1 = arith.constant 0 : i32
    return %c0_i32, %arg0, %c0_i32_0 : i32, i32, i32
  }
}

</mosaic_0001>

<bundles_post_ra>
// kernel: tpu_custom_call.1
= control target key start
LH: loop header
LB: loop body
LE: loop exit
PB: predicated region body
PF: predicated region fallthrough
CT: control target
= control target key end

     0   :  { %13 = vsyncpa [#allocation3], 0  ;;  %s2675_s0 = inlined_call_operand.hbm [shape: bf16[8,1024], index: 0, kind: input, shape index: {}]   ;;  %s2676_s1 = inlined_call_operand.hbm [shape: bf16[8,1024], index: 1, kind: input, shape index: {}]   ;;  %s2677_s2 = inlined_call_operand.hbm [shape: f32[8,128], index: 2, kind: input, shape index: {}]   ;;  %s2678_s3 = inlined_call_operand.hbm [shape: bf16[1024,128], index: 3, kind: input, shape index: {}]   ;;  %s2679_s4 = inlined_call_operand.hbm [shape: bf16[128,256], index: 4, kind: input, shape index: {}]   ;;  %s2680_s5 = inlined_call_operand.vmem [shape: f32[1,256], index: 5, kind: input, shape index: {}]   ;;  %s2681_s6 = inlined_call_operand.hbm [shape: bf16[256,128], index: 6, kind: input, shape index: {}]   ;;  %s2682_s7 = inlined_call_operand.vmem [shape: f32[1,128], index: 7, kind: input, shape index: {}]   ;;  %s2683_s8 = inlined_call_operand.hbm [shape: f32[2,8,128], index: 8, kind: output, shape index: {}]  }
   0x1   :  { %14 = vsyncpa [#allocation6], 0 }
   0x2   :  { %15 = vsyncpa [#allocation9], 0 }
   0x3   :  { %16 = vsyncpa [#allocation12], 0 }
   0x4   :  { %17 = vsyncpa [#allocation4], 0  ;;  %s2111_s27 = smov [#allocation5]   ;;  %s2112_s29 = smov [#allocation8]  }
   0x5   :  { %s34_s28 = sshll.u32 %s2111_s27, 4  ;;  %s53_s30 = sshll.u32 %s2112_s29, 4  ;;  %s35_s28 = int_to_ptr.vmem [resolvable:$true] %s34_s28  ;;  %s2168_s30 = int_to_ptr.vmem [resolvable:$true] %s53_s30 }
   0x6   :  { %s1947_s11 = scalar_lea.hbm %s2676_s1, 512 }
   0x7   :  { %p1948_p0 = scmp.ne.s32.totalorder %s2676_s1, %s1947_s11  ;;  %p1951_p1 = scmp.lt.u32.totalorder %s1947_s11, %s2676_s1 }
   0x9   :  { %p1953_p2 = pnand %p1951_p1, %p1948_p0 }
   0xb   :  { %1956 = shalt.err (!%p1953_p2)
}
   0xc   :  { %s1957_s16 = scalar_lea.vmem %s35_s28, 512  ;;  %p1962_p4 = scmp.lt.s32.totalorder %s35_s28, %s35_s28 }
   0xd   :  { %p1958_p3 = scmp.ne.s32.totalorder %s35_s28, %s1957_s16  ;;  %p1963_p5 = scmp.lt.s32.totalorder %s1957_s16, %s1957_s16 }
   0xf   :  { %p1964_p6 = por %p1963_p5, %p1962_p4 }
  0x11   :  { %p1965_p7 = pnand %p1964_p6, %p1958_p3 }
  0x13   :  { %1968 = shalt.err (!%p1965_p7)
}
  0x14   :  { %37 = dma.hbm_to_vmem [thread:$0]  %s2676_s1, 512, %s35_s28, [#allocation6]  }
  0x15   :  { %s1969_s21 = scalar_lea.hbm %s2678_s3, 8192 }
  0x16   :  { %p1970_p8 = scmp.ne.s32.totalorder %s2678_s3, %s1969_s21  ;;  %p1973_p9 = scmp.lt.u32.totalorder %s1969_s21, %s2678_s3 }
  0x18   :  { %p1975_p10 = pnand %p1973_p9, %p1970_p8 }
  0x1a   :  { %1978 = shalt.err (!%p1975_p10)
}
  0x1b   :  { %s1979_s26 = scalar_lea.vmem %s2168_s30, 8192  ;;  %p1984_p12 = scmp.lt.s32.totalorder %s2168_s30, %s2168_s30 }
  0x1c   :  { %p1980_p11 = scmp.ne.s32.totalorder %s2168_s30, %s1979_s26  ;;  %p1985_p13 = scmp.lt.s32.totalorder %s1979_s26, %s1979_s26 }
  0x1e   :  { %p1986_p0 = por %p1985_p13, %p1984_p12 }
  0x20   :  { %p1987_p1 = pnand %p1986_p0, %p1980_p11 }
  0x22   :  { %1990 = shalt.err (!%p1987_p1)
}
  0x23   :  { %s2113_s1 = smov 64   ;;  %s2114_s27 = smov 4  }
  0x24   :  { %59 = dma.hbm_to_vmem [thread:$0]  %s2678_s3, 8192, %s2168_s30, [#allocation9], %s2113_s1, %s2113_s1, %s2114_s27  }
  0x25   :  { %s2115_s9 = smov [#allocation2]   ;;  %s2116_s11 = smov [#allocation7]  }
  0x26   :  { %s24_s10 = sshll.u32 %s2115_s9, 4  ;;  %s44_s12 = sshll.u32 %s2116_s11, 4  ;;  %s25_s10 = int_to_ptr.vmem [resolvable:$true] %s24_s10  ;;  %s45_s12 = int_to_ptr.vmem [resolvable:$true] %s44_s12 }
  0x27   :  { %s1991_s15 = scalar_lea.hbm %s2675_s0, 512 }
  0x28   :  { %p1992_p2 = scmp.ne.s32.totalorder %s2675_s0, %s1991_s15  ;;  %p1995_p3 = scmp.lt.u32.totalorder %s1991_s15, %s2675_s0 }
  0x2a   :  { %p1997_p4 = pnand %p1995_p3, %p1992_p2 }
  0x2c   :  { %2000 = shalt.err (!%p1997_p4)
}
  0x2d   :  { %s2001_s3 = scalar_lea.vmem %s25_s10, 512  ;;  %p2006_p6 = scmp.lt.s32.totalorder %s25_s10, %s25_s10 }
  0x2e   :  { %p2002_p5 = scmp.ne.s32.totalorder %s25_s10, %s2001_s3  ;;  %p2007_p7 = scmp.lt.s32.totalorder %s2001_s3, %s2001_s3 }
  0x30   :  { %p2008_p8 = por %p2007_p7, %p2006_p6 }
  0x32   :  { %p2009_p9 = pnand %p2008_p8, %p2002_p5 }
  0x34   :  { %2012 = shalt.err (!%p2009_p9)
}
  0x35   :  { %27 = dma.hbm_to_vmem [thread:$0]  %s2675_s0, 512, %s25_s10, [#allocation3]  }
  0x36   :  { %s2013_s23 = scalar_lea.hbm %s2677_s2, 128 }
  0x37   :  { %p2014_p10 = scmp.ne.s32.totalorder %s2677_s2, %s2013_s23  ;;  %p2017_p11 = scmp.lt.u32.totalorder %s2013_s23, %s2677_s2 }
  0x39   :  { %p2019_p12 = pnand %p2017_p11, %p2014_p10 }
  0x3b   :  { %2022 = shalt.err (!%p2019_p12)
}
  0x3c   :  { %s2023_s29 = scalar_lea.vmem %s45_s12, 128  ;;  %p2028_p0 = scmp.lt.s32.totalorder %s45_s12, %s45_s12 }
  0x3d   :  { %p2024_p13 = scmp.ne.s32.totalorder %s45_s12, %s2023_s29  ;;  %p2029_p1 = scmp.lt.s32.totalorder %s2023_s29, %s2023_s29 }
  0x3f   :  { %p2030_p2 = por %p2029_p1, %p2028_p0 }
  0x41   :  { %p2031_p3 = pnand %p2030_p2, %p2024_p13 }
  0x43   :  { %2034 = shalt.err (!%p2031_p3)
}
  0x44   :  { %47 = dma.hbm_to_vmem [thread:$0]  %s2677_s2, 128, %s45_s12, [#allocation6]  }
  0x45   :  { %s2117_s10 = smov [#allocation10]   ;;  %s2035_s15 = scalar_lea.hbm %s2679_s4, 2048 }
  0x46   :  { %s65_s11 = sshll.u32 %s2117_s10, 4  ;;  %p2036_p4 = scmp.ne.s32.totalorder %s2679_s4, %s2035_s15  ;;  %s66_s11 = int_to_ptr.vmem [resolvable:$true] %s65_s11 }
  0x47   :  { %p2039_p5 = scmp.lt.u32.totalorder %s2035_s15, %s2679_s4 }
  0x49   :  { %p2041_p6 = pnand %p2039_p5, %p2036_p4 }
  0x4b   :  { %2044 = shalt.err (!%p2041_p6)
}
  0x4c   :  { %s2045_s3 = scalar_lea.vmem %s66_s11, 2048  ;;  %p2050_p8 = scmp.lt.s32.totalorder %s66_s11, %s66_s11 }
  0x4d   :  { %p2046_p7 = scmp.ne.s32.totalorder %s66_s11, %s2045_s3  ;;  %p2051_p9 = scmp.lt.s32.totalorder %s2045_s3, %s2045_s3 }
  0x4f   :  { %p2052_p10 = por %p2051_p9, %p2050_p8 }
  0x51   :  { %p2053_p11 = pnand %p2052_p10, %p2046_p7 }
  0x53   :  { %2056 = shalt.err (!%p2053_p11)
}
  0x54   :  { %s2118_s2 = smov 128   ;;  %s2119_s12 = smov 8  }
  0x55   :  { %71 = dma.hbm_to_vmem [thread:$0]  %s2679_s4, 2048, %s66_s11, [#allocation9], %s2118_s2, %s2118_s2, %s2119_s12  }
  0x56   :  { %s2120_s21 = smov [#allocation11]   ;;  %s2057_s25 = scalar_lea.hbm %s2681_s6, 2048 }
  0x57   :  { %s79_s22 = sshll.u32 %s2120_s21, 4  ;;  %p2058_p12 = scmp.ne.s32.totalorder %s2681_s6, %s2057_s25  ;;  %s80_s22 = int_to_ptr.vmem [resolvable:$true] %s79_s22 }
  0x58   :  { %p2061_p13 = scmp.lt.u32.totalorder %s2057_s25, %s2681_s6 }
  0x5a   :  { %p2063_p0 = pnand %p2061_p13, %p2058_p12 }
  0x5c   :  { %2066 = shalt.err (!%p2063_p0)
}
  0x5d   :  { %s2067_s9 = scalar_lea.vmem %s80_s22, 2048  ;;  %p2072_p2 = scmp.lt.s32.totalorder %s80_s22, %s80_s22 }
  0x5e   :  { %p2068_p1 = scmp.ne.s32.totalorder %s80_s22, %s2067_s9  ;;  %p2073_p3 = scmp.lt.s32.totalorder %s2067_s9, %s2067_s9 }
  0x60   :  { %p2074_p4 = por %p2073_p3, %p2072_p2 }
  0x62   :  { %p2075_p5 = pnand %p2074_p4, %p2068_p1 }
  0x64   :  { %2078 = shalt.err (!%p2075_p5)
}
  0x65   :  { %85 = dma.hbm_to_vmem [thread:$0]  %s2681_s6, 2048, %s80_s22, [#allocation12], %s2113_s1, %s2113_s1, %s2114_s27  }
  0x66   :  { %2101 = dma.done.wait [#allocation3], 512  }
  0x67   :  { %2102 = vsyncadd [#allocation3], 4294966784 }
  0x68   :  { %2103 = dma.done.wait [#allocation6], 640  }
  0x69   :  { %2104 = vsyncadd [#allocation6], 4294966656 }
  0x6a   :  { %2105 = dma.done.wait [#allocation9], 10240  }
  0x6b   :  { %2106 = vsyncadd [#allocation9], 4294957056 }
  0x6c   :  { %2107 = dma.done.wait [#allocation12], 2048  }
  0x6d   :  { %2108 = vsyncadd [#allocation12], 4294965248  ;;  %v2256_v0 = vld [vmem:[#allocation8 + $0x40] sm:$0xff]   ;;  %v2267_v4 = vld [vmem:[#allocation8 + $0x48] sm:$0xff]  }
  0x6e   :  { %v2258_v1 = vld [vmem:[#allocation8 + $0xc0] sm:$0xff]   ;;  %1587 = vmatprep.subr.bf16.mxu0 %v2256_v0  ;;  %v2270_v5 = vld [vmem:[#allocation8 + $0xc8] sm:$0xff]   ;;  %v2279_v8 = vld [vmem:[#allocation8 + $0x50] sm:$0xff]  }
  0x6f   :  { %v2261_v2 = vld [vmem:[#allocation8] sm:$0xff]   ;;  %1609 = vmatprep.subr.bf16.mxu1 %v2258_v1  ;;  %2725 = vst [vmem:[#allocation20_spill] sm:$0xff] %v2270_v5  ;;  %v2273_v6 = vld [vmem:[#allocation8 + $0x8] sm:$0xff]   ;;  %v2282_v9 = vld [vmem:[#allocation8 + $0xd0] sm:$0xff]  }
  0x70   :  { %v2264_v3 = vld [vmem:[#allocation8 + $0x80] sm:$0xff]   ;;  %1588 = vmatpush3.bf16.msra.mxu0 %v2261_v2  ;;  %v2276_v7 = vld [vmem:[#allocation8 + $0x88] sm:$0xff]   ;;  %2727 = vst [vmem:[#allocation22_spill] sm:$0xff] %v2282_v9  ;;  %v2285_v10 = vld [vmem:[#allocation8 + $0x10] sm:$0xff]  }
  0x71   :  { %2724 = vst [vmem:[#allocation19_spill] sm:$0xff] %v2264_v3  ;;  %1610 = vmatpush3.bf16.msra.mxu1 %v2264_v3  ;;  %1589 = vmatprep.subr.bf16.mxu0 %v2267_v4  ;;  %2726 = vst [vmem:[#allocation21_spill] sm:$0xff] %v2276_v7  ;;  %v2288_v11 = vld [vmem:[#allocation8 + $0x90] sm:$0xff]   ;;  %v2291_v12 = vld [vmem:[#allocation8 + $0x58] sm:$0xff]  }
  0x72   :  { %1611 = vmatprep.subr.bf16.mxu1 %v2270_v5  ;;  %2728 = vst [vmem:[#allocation23_spill] sm:$0xff] %v2288_v11  ;;  %v2294_v13 = vld [vmem:[#allocation8 + $0xd8] sm:$0xff]   ;;  %v2303_v16 = vld [vmem:[#allocation8 + $0x60] sm:$0xff]   ;;  %v2315_v20 = vld [vmem:[#allocation8 + $0x68] sm:$0xff]  }
  0x73   :  { %2729 = vst [vmem:[#allocation24_spill] sm:$0xff] %v2294_v13  ;;  %v2297_v14 = vld [vmem:[#allocation8 + $0x18] sm:$0xff]   ;;  %v2306_v17 = vld [vmem:[#allocation8 + $0xe0] sm:$0xff]   ;;  %v2318_v21 = vld [vmem:[#allocation8 + $0xe8] sm:$0xff]  }
  0x74   :  { %1590 = vmatpush3.bf16.msra.mxu0 %v2273_v6  ;;  %v2300_v15 = vld [vmem:[#allocation8 + $0x98] sm:$0xff]   ;;  %2731 = vst [vmem:[#allocation26_spill] sm:$0xff] %v2306_v17  ;;  %v2309_v18 = vld [vmem:[#allocation8 + $0x20] sm:$0xff]   ;;  %2733 = vst [vmem:[#allocation28_spill] sm:$0xff] %v2318_v21 }
  0x75   :  { %1612 = vmatpush3.bf16.msra.mxu1 %v2276_v7  ;;  %1591 = vmatprep.subr.bf16.mxu0 %v2279_v8  ;;  %2730 = vst [vmem:[#allocation25_spill] sm:$0xff] %v2300_v15  ;;  %v2312_v19 = vld [vmem:[#allocation8 + $0xa0] sm:$0xff]   ;;  %v2321_v22 = vld [vmem:[#allocation8 + $0x28] sm:$0xff]   ;;  %v2327_v24 = vld [vmem:[#allocation8 + $0x70] sm:$0xff]  }
  0x76   :  { %1613 = vmatprep.subr.bf16.mxu1 %v2282_v9  ;;  %2732 = vst [vmem:[#allocation27_spill] sm:$0xff] %v2312_v19  ;;  %v2324_v23 = vld [vmem:[#allocation8 + $0xa8] sm:$0xff]   ;;  %v2330_v25 = vld [vmem:[#allocation8 + $0xf0] sm:$0xff]   ;;  %v2339_v28 = vld [vmem:[#allocation8 + $0x78] sm:$0xff]  }
  0x77   :  { %2734 = vst [vmem:[#allocation29_spill] sm:$0xff] %v2324_v23  ;;  %2735 = vst [vmem:[#allocation30_spill] sm:$0xff] %v2330_v25  ;;  %v2333_v26 = vld [vmem:[#allocation8 + $0x30] sm:$0xff]   ;;  %v2342_v29 = vld [vmem:[#allocation8 + $0xf8] sm:$0xff]  }
  0x78   :  { %1592 = vmatpush3.bf16.msra.mxu0 %v2285_v10  ;;  %v2336_v27 = vld [vmem:[#allocation8 + $0xb0] sm:$0xff]   ;;  %2737 = vst [vmem:[#allocation32_spill] sm:$0xff] %v2342_v29  ;;  %v2345_v30 = vld [vmem:[#allocation8 + $0x38] sm:$0xff]   ;;  %v287_v33 = vld [vmem:[#allocation2 + $0x8] sm:$0xff] }
  0x79   :  { %1614 = vmatpush3.bf16.msra.mxu1 %v2288_v11  ;;  %1593 = vmatprep.subr.bf16.mxu0 %v2291_v12  ;;  %2736 = vst [vmem:[#allocation31_spill] sm:$0xff] %v2336_v27  ;;  %v2348_v31 = vld [vmem:[#allocation8 + $0xb8] sm:$0xff]   ;;  %v1476_v36 = vcombine.low %v287_v33, %v287_v33  ;;  %v1477_v37 = vcombine.high %v287_v33, %v287_v33  ;;  %v2352_v38 = vld [vmem:[#allocation8 + $0x140] sm:$0xff]   ;;  %v2362_v42 = vld [vmem:[#allocation8 + $0x148] sm:$0xff]  }
  0x7a   :  { %1615 = vmatprep.subr.bf16.mxu1 %v2294_v13  ;;  %2738 = vst [vmem:[#allocation33_spill] sm:$0xff] %v2348_v31  ;;  %v286_v32 = vld [vmem:[#allocation2] sm:$0xff]  ;;  %v2354_v39 = vld [vmem:[#allocation8 + $0x1c0] sm:$0xff]   ;;  %v2366_v43 = vld [vmem:[#allocation8 + $0x1c8] sm:$0xff]  }
  0x7b   :  { %v1474_v34 = vcombine.low %v286_v32, %v286_v32  ;;  %v1475_v35 = vcombine.high %v286_v32, %v286_v32  ;;  %2739 = vst [vmem:[#allocation34_spill] sm:$0xff] %v2354_v39  ;;  %774 = vmatprep.mubr.bf16.mxu1 %v1477_v37  ;;  %v2356_v40 = vld [vmem:[#allocation8 + $0x100] sm:$0xff]   ;;  %2741 = vst [vmem:[#allocation36_spill] sm:$0xff] %v2366_v43  ;;  %v2369_v44 = vld [vmem:[#allocation8 + $0x108] sm:$0xff]  }
  0x7c   :  { %1594 = vmatpush3.bf16.msra.mxu0 %v2297_v14  ;;  %v2358_v41 = vld [vmem:[#allocation8 + $0x180] sm:$0xff]   ;;  %v2372_v45 = vld [vmem:[#allocation8 + $0x188] sm:$0xff]   ;;  %v2374_v46 = vld [vmem:[#allocation8 + $0x150] sm:$0xff]  }
  0x7d   :  { %1616 = vmatpush3.bf16.msra.mxu1 %v2300_v15  ;;  %1595 = vmatprep.subr.bf16.mxu0 %v2303_v16  ;;  %2740 = vst [vmem:[#allocation35_spill] sm:$0xff] %v2358_v41  ;;  %2742 = vst [vmem:[#allocation37_spill] sm:$0xff] %v2372_v45  ;;  %v2378_v47 = vld [vmem:[#allocation8 + $0x1d0] sm:$0xff]   ;;  %v2386_v50 = vld [vmem:[#allocation8 + $0x158] sm:$0xff]  }
  0x7e   :  { %1617 = vmatprep.subr.bf16.mxu1 %v2306_v17  ;;  %734 = vmatprep.mubr.bf16.mxu0 %v1475_v35  ;;  %2743 = vst [vmem:[#allocation38_spill] sm:$0xff] %v2378_v47  ;;  %v2381_v48 = vld [vmem:[#allocation8 + $0x110] sm:$0xff]   ;;  %v2390_v51 = vld [vmem:[#allocation8 + $0x1d8] sm:$0xff]   ;;  %v2398_v54 = vld [vmem:[#allocation8 + $0x160] sm:$0xff]  }
  0x7f   :  { %v2384_v49 = vld [vmem:[#allocation8 + $0x190] sm:$0xff]   ;;  %2745 = vst [vmem:[#allocation40_spill] sm:$0xff] %v2390_v51  ;;  %v2393_v52 = vld [vmem:[#allocation8 + $0x118] sm:$0xff]   ;;  %v2402_v55 = vld [vmem:[#allocation8 + $0x1e0] sm:$0xff]  }
  0x80   :  { %1596 = vmatpush3.bf16.msra.mxu0 %v2309_v18  ;;  %2744 = vst [vmem:[#allocation39_spill] sm:$0xff] %v2384_v49  ;;  %v2396_v53 = vld [vmem:[#allocation8 + $0x198] sm:$0xff]   ;;  %2747 = vst [vmem:[#allocation42_spill] sm:$0xff] %v2402_v55  ;;  %v2405_v56 = vld [vmem:[#allocation8 + $0x120] sm:$0xff]  }
  0x81   :  { %1618 = vmatpush3.bf16.msra.mxu1 %v2312_v19  ;;  %1597 = vmatprep.subr.bf16.mxu0 %v2315_v20  ;;  %2746 = vst [vmem:[#allocation41_spill] sm:$0xff] %v2396_v53  ;;  %v2408_v57 = vld [vmem:[#allocation8 + $0x1a0] sm:$0xff]   ;;  %v2410_v58 = vld [vmem:[#allocation8 + $0x168] sm:$0xff]   ;;  %v2422_v62 = vld [vmem:[#allocation8 + $0x170] sm:$0xff]  }
  0x82   :  { %1619 = vmatprep.subr.bf16.mxu1 %v2318_v21  ;;  %2748 = vst [vmem:[#allocation43_spill] sm:$0xff] %v2408_v57  ;;  %v2414_v59 = vld [vmem:[#allocation8 + $0x1e8] sm:$0xff]   ;;  %v2426_v63 = vld [vmem:[#allocation8 + $0x1f0] sm:$0xff]   ;;  %v2438_v35 = vld [vmem:[#allocation8 + $0x1f8] sm:$0xff]  }
  0x83   :  { %2749 = vst [vmem:[#allocation44_spill] sm:$0xff] %v2414_v59  ;;  %v2417_v60 = vld [vmem:[#allocation8 + $0x128] sm:$0xff]   ;;  %2751 = vst [vmem:[#allocation46_spill] sm:$0xff] %v2426_v63  ;;  %v2429_v32 = vld [vmem:[#allocation8 + $0x130] sm:$0xff]  }
  0x84   :  { %1598 = vmatpush3.bf16.msra.mxu0 %v2321_v22  ;;  %v2420_v61 = vld [vmem:[#allocation8 + $0x1a8] sm:$0xff]   ;;  %v2432_v33 = vld [vmem:[#allocation8 + $0x1b0] sm:$0xff]   ;;  %2753 = vst [vmem:[#allocation48_spill] sm:$0xff] %v2438_v35  ;;  %v2444_v37 = vld [vmem:[#allocation8 + $0x1b8] sm:$0xff]  }
  0x85   :  { %1620 = vmatpush3.bf16.msra.mxu1 %v2324_v23  ;;  %1599 = vmatprep.subr.bf16.mxu0 %v2327_v24  ;;  %2750 = vst [vmem:[#allocation45_spill] sm:$0xff] %v2420_v61  ;;  %2752 = vst [vmem:[#allocation47_spill] sm:$0xff] %v2432_v33 }
  0x86   :  { %1621 = vmatprep.subr.bf16.mxu1 %v2330_v25  ;;  %2754 = vst [vmem:[#allocation49_spill] sm:$0xff] %v2444_v37  ;;  %v2498_v25 = vld [vmem:[#allocation7] sm:$0xff] }
  0x88   :  { %1600 = vmatpush3.bf16.msra.mxu0 %v2333_v26 }
  0x89   :  { %1622 = vmatpush3.bf16.msra.mxu1 %v2336_v27  ;;  %1601 = vmatprep.subr.bf16.mxu0 %v2339_v28 }
  0x8a   :  { %1623 = vmatprep.subr.bf16.mxu1 %v2342_v29 }
  0x8c   :  { %1602 = vmatpush3.bf16.msra.mxu0 %v2345_v30 }
  0x8d   :  { %1624 = vmatpush3.bf16.msra.mxu1 %v2348_v31  ;;  %1631 = vmatprep.subr.bf16.mxu0 %v2352_v38  ;;  %v2717_v31 = vmov 0  }
  0x8e   :  { %1653 = vmatprep.subr.bf16.mxu1 %v2354_v39  ;;  %v2492_v39 = vld [vmem:[#allocation10 + $0x70] ss:$8 sps:$4 sm:$0xff]  }
  0x8f   :  { %735 = vmatmul.mubr.bf16.vlgmr.msra.gmra.mrb[0].mxu0 %v1474_v34  ;;  %v2434_v34 = vld [vmem:[#allocation8 + $0x178] sm:$0xff]   ;;  %2762 = vst [vmem:[#allocation57_spill] sm:$0xff] %v2492_v39 }
  0x90   :  { %775 = vmatmul.mubr.bf16.vlgmr.msra.gmra.mrb[0].mxu1 %v1476_v36  ;;  %1632 = vmatpush3.bf16.msra.mxu0 %v2356_v40  ;;  %v2441_v36 = vld [vmem:[#allocation8 + $0x138] sm:$0xff]  }
  0x91   :  { %1654 = vmatpush3.bf16.msra.mxu1 %v2358_v41  ;;  %1633 = vmatprep.subr.bf16.mxu0 %v2362_v42  ;;  %v2490_v41 = vld [vmem:[#allocation10 + $0x74] ss:$8 sps:$4 sm:$0xff]  }
  0x92   :  { %1655 = vmatprep.subr.bf16.mxu1 %v2366_v43  ;;  %v2486_v43 = vld [vmem:[#allocation10 + $0x60] ss:$8 sps:$4 sm:$0xff]   ;;  %2761 = vst [vmem:[#allocation56_spill] sm:$0xff] %v2490_v41 }
  0x93   :  { %2760 = vst [vmem:[#allocation55_spill] sm:$0xff] %v2486_v43 }
  0x94   :  { %1634 = vmatpush3.bf16.msra.mxu0 %v2369_v44 }
  0x95   :  { %1656 = vmatpush3.bf16.msra.mxu1 %v2372_v45  ;;  %1635 = vmatprep.subr.bf16.mxu0 %v2374_v46  ;;  %v2484_v45 = vld [vmem:[#allocation10 + $0x64] ss:$8 sps:$4 sm:$0xff]  }
  0x96   :  { %1657 = vmatprep.subr.bf16.mxu1 %v2378_v47  ;;  %v2480_v47 = vld [vmem:[#allocation10 + $0x50] ss:$8 sps:$4 sm:$0xff]   ;;  %2759 = vst [vmem:[#allocation54_spill] sm:$0xff] %v2484_v45 }
  0x97   :  { %2758 = vst [vmem:[#allocation53_spill] sm:$0xff] %v2480_v47 }
  0x98   :  { %1636 = vmatpush3.bf16.msra.mxu0 %v2381_v48 }
  0x99   :  { %1658 = vmatpush3.bf16.msra.mxu1 %v2384_v49  ;;  %1637 = vmatprep.subr.bf16.mxu0 %v2386_v50  ;;  %v2477_v49 = vld [vmem:[#allocation10 + $0x54] ss:$8 sps:$4 sm:$0xff]  }
  0x9a   :  { %1659 = vmatprep.subr.bf16.mxu1 %v2390_v51  ;;  %v2450_v51 = vld [vmem:[#allocation10 + $0x4] ss:$8 sps:$4 sm:$0xff]   ;;  %2757 = vst [vmem:[#allocation52_spill] sm:$0xff] %v2477_v49 }
  0x9c   :  { %1638 = vmatpush3.bf16.msra.mxu0 %v2393_v52 }
  0x9d   :  { %1660 = vmatpush3.bf16.msra.mxu1 %v2396_v53  ;;  %1639 = vmatprep.subr.bf16.mxu0 %v2398_v54  ;;  %v2448_v53 = vld [vmem:[#allocation10] ss:$8 sps:$4 sm:$0xff]  }
  0x9e   :  { %1661 = vmatprep.subr.bf16.mxu1 %v2402_v55 }
  0xa0   :  { %1640 = vmatpush3.bf16.msra.mxu0 %v2405_v56 }
  0xa1   :  { %1662 = vmatpush3.bf16.msra.mxu1 %v2408_v57  ;;  %1641 = vmatprep.subr.bf16.mxu0 %v2410_v58  ;;  %v289_v57 = vld [vmem:[#allocation2 + $0x18] sm:$0xff] }
  0xa2   :  { %1663 = vmatprep.subr.bf16.mxu1 %v2414_v59  ;;  %v1480_v55 = vcombine.low %v289_v57, %v289_v57 }
  0xa4   :  { %1642 = vmatpush3.bf16.msra.mxu0 %v2417_v60 }
  0xa5   :  { %1664 = vmatpush3.bf16.msra.mxu1 %v2420_v61  ;;  %1643 = vmatprep.subr.bf16.mxu0 %v2422_v62  ;;  %v288_v61 = vld [vmem:[#allocation2 + $0x10] sm:$0xff] }
  0xa6   :  { %1665 = vmatprep.subr.bf16.mxu1 %v2426_v63  ;;  %v1478_v63 = vcombine.low %v288_v61, %v288_v61  ;;  %v1479_v59 = vcombine.high %v288_v61, %v288_v61  ;;  %v2456_v61 = vld [vmem:[#allocation10 + $0x10] ss:$8 sps:$4 sm:$0xff]  }
  0xa8   :  { %1644 = vmatpush3.bf16.msra.mxu0 %v2429_v32  ;;  %814 = vmatprep.mubr.bf16.mxu0 %v1479_v59  ;;  %v2468_v59 = vld [vmem:[#allocation10 + $0x30] ss:$8 sps:$4 sm:$0xff]  }
  0xa9   :  { %1666 = vmatpush3.bf16.msra.mxu1 %v2432_v33  ;;  %1645 = vmatprep.subr.bf16.mxu0 %v2434_v34  ;;  %v1481_v33 = vcombine.high %v289_v57, %v289_v57  ;;  %v2462_v57 = vld [vmem:[#allocation10 + $0x20] ss:$8 sps:$4 sm:$0xff]  }
  0xaa   :  { %1667 = vmatprep.subr.bf16.mxu1 %v2438_v35  ;;  %v2452_v35 = vld [vmem:[#allocation10 + $0x14] ss:$8 sps:$4 sm:$0xff]  }
  0xab   :  { %854 = vmatprep.mubr.bf16.mxu1 %v1481_v33  ;;  %v2474_v33 = vld [vmem:[#allocation10 + $0x40] ss:$8 sps:$4 sm:$0xff]  }
  0xac   :  { %1646 = vmatpush3.bf16.msra.mxu0 %v2441_v36  ;;  %2756 = vst [vmem:[#allocation51_spill] sm:$0xff] %v2474_v33 }
  0xad   :  { %1668 = vmatpush3.bf16.msra.mxu1 %v2444_v37  ;;  %954 = vmatprep.subr.bf16.mxu0 %v2450_v51  ;;  %v2459_v37 = vld [vmem:[#allocation10 + $0x24] ss:$8 sps:$4 sm:$0xff]  }
  0xaf   :  { %815 = vmatmul.mubr.bf16.vlgmr.msra.gmra.mrb[4].mxu0 %v1478_v63  ;;  %v2471_v63 = vld [vmem:[#allocation10 + $0x44] ss:$8 sps:$4 sm:$0xff]  }
  0xb0   :  { %855 = vmatmul.mubr.bf16.vlgmr.msra.gmra.mrb[4].mxu1 %v1480_v55  ;;  %955 = vmatpush1.bf16.msra.mxu0 %v2448_v53  ;;  %v2465_v55 = vld [vmem:[#allocation10 + $0x34] ss:$8 sps:$4 sm:$0xff]   ;;  %2755 = vst [vmem:[#allocation50_spill] sm:$0xff] %v2471_v63 }
  0xb1   :  { %956 = vmatprep.subr.bf16.mxu0 %v2452_v35  ;;  %986 = vmatprep.mubr.bf16.mxu0 %v2717_v31 }
  0xb4   :  { %957 = vmatpush1.bf16.msra.mxu0 %v2456_v61 }
  0xb5   :  { %958 = vmatprep.subr.bf16.mxu0 %v2459_v37 }
  0xb8   :  { %959 = vmatpush1.bf16.msra.mxu0 %v2462_v57 }
  0xb9   :  { %960 = vmatprep.subr.bf16.mxu0 %v2465_v55 }
  0xbc   :  { %961 = vmatpush1.bf16.msra.mxu0 %v2468_v59 }
  0xbd   :  { %962 = vmatprep.subr.bf16.mxu0 %v2471_v63 }
  0xc0   :  { %963 = vmatpush1.bf16.msra.mxu0 %v2474_v33 }
  0xc1   :  { %964 = vmatprep.subr.bf16.mxu0 %v2477_v49 }
  0xc4   :  { %965 = vmatpush1.bf16.msra.mxu0 %v2480_v47 }
  0xc5   :  { %966 = vmatprep.subr.bf16.mxu0 %v2484_v45 }
  0xc8   :  { %967 = vmatpush1.bf16.msra.mxu0 %v2486_v43 }
  0xc9   :  { %968 = vmatprep.subr.bf16.mxu0 %v2490_v41 }
  0xcc   :  { %969 = vmatpush1.bf16.msra.mxu0 %v2492_v39 }
  0xcd   :  { %1697 = vmatprep.subr.bf16.mxu0 %v2256_v0 }
 0x162   :  { %v1603_v29 = vpop.f32.mrb[0].mxu0 }
 0x163   :  { %v1625_v27 = vpop.f32.mrb[0].mxu1  ;;  %v1604_v23 = vpop.f32.mrb[1].mxu0 }
 0x164   :  { %v1626_v21 = vpop.f32.mrb[1].mxu1  ;;  %v1605_v19 = vadd.f32 %v1604_v23, %v1603_v29  ;;  %v1606_v15 = vpop.f32.mrb[2].mxu0  ;;  %v2766_v29 = vld [vmem:[#allocation52_spill] sm:$0xff] }
 0x165   :  { %v1627_v17 = vadd.f32 %v1626_v21, %v1625_v27  ;;  %v1628_v13 = vpop.f32.mrb[2].mxu1  ;;  %v1607_v11 = vpop.f32.mrb[3].mxu0  ;;  %v2555_v15 = vld [vmem:[#allocation11 + $0x30] sm:$0xff]   ;;  %v2764_v27 = vld [vmem:[#allocation50_spill] sm:$0xff] }
 0x166   :  { %v1629_v9 = vpop.f32.mrb[3].mxu1  ;;  %v737_v7 = vadd.f32 %v1605_v19, %v2498_v25  ;;  %v2543_v11 = vld [vmem:[#allocation11 + $0x20] sm:$0xff]   ;;  %v2549_v13 = vld [vmem:[#allocation11 + $0x28] sm:$0xff]  }
 0x167   :  { %v2537_v9 = vld [vmem:[#allocation11 + $0x18] sm:$0xff]  }
 0x168   :  { %v777_v5 = vadd.f32 %v1627_v17, %v737_v7  ;;  %v2531_v7 = vld [vmem:[#allocation11 + $0x10] sm:$0xff]   ;;  %v2561_v17 = vld [vmem:[#allocation11 + $0x38] sm:$0xff]  }
 0x182   :  { %v1647_v3 = vpop.f32.mrb[4].mxu0 }
 0x183   :  { %v1669_v0 = vpop.f32.mrb[4].mxu1  ;;  %v1648_v39 = vpop.f32.mrb[5].mxu0 }
 0x184   :  { %v1670_v41 = vpop.f32.mrb[5].mxu1  ;;  %v1649_v31 = vadd.f32 %v1648_v39, %v1647_v3  ;;  %v1650_v45 = vpop.f32.mrb[6].mxu0  ;;  %v2519_v3 = vld [vmem:[#allocation11] sm:$0xff]   ;;  %v2770_v39 = vld [vmem:[#allocation56_spill] sm:$0xff] }
 0x185   :  { %v1671_v43 = vadd.f32 %v1670_v41, %v1669_v0  ;;  %v1672_v47 = vpop.f32.mrb[6].mxu1  ;;  %v1651_v49 = vpop.f32.mrb[7].mxu0  ;;  %v864_v41 = vlaneseq }
 0x186   :  { %v1673_v33 = vpop.f32.mrb[7].mxu1  ;;  %v817_v63 = vadd.f32 %v1649_v31, %v777_v5  ;;  %v2525_v5 = vld [vmem:[#allocation11 + $0x8] sm:$0xff]  }
 0x187   :  { %v2768_v31 = vld [vmem:[#allocation54_spill] sm:$0xff] }
 0x188   :  { %v857_v23 = vadd.f32 %v1671_v43, %v817_v63 }
 0x18a   :  { %v862_v21 = vpack.c.bf16 %v857_v23, %v857_v23  ;;  %v1159_v23 = vld [vmem:[#allocation5 + $0x8] sm:$0xff] }
 0x18c   :  { %987 = vmatmul.mubr.bf16.vlgmr.msra.gmra.mrb[8].mxu0 %v862_v21 }
 0x18d   :  { %1698 = vmatpush3.bf16.msra.mxu0 %v2261_v2  ;;  %v2517_v2 = vld [vmem:[#allocation11 + $0x40] sm:$0xff]  }
 0x18e   :  { %1699 = vmatprep.subr.bf16.mxu0 %v2267_v4  ;;  %1675 = vmatprep.subr.bf16.mxu1 %v2517_v2  ;;  %v2523_v4 = vld [vmem:[#allocation11 + $0x48] sm:$0xff]  }
 0x18f   :  { %1676 = vmatpush3.bf16.msra.mxu1 %v2519_v3 }
 0x190   :  { %1677 = vmatprep.subr.bf16.mxu1 %v2523_v4 }
 0x191   :  { %1700 = vmatpush3.bf16.msra.mxu0 %v2273_v6  ;;  %v2529_v6 = vld [vmem:[#allocation11 + $0x50] sm:$0xff]  }
 0x192   :  { %1701 = vmatprep.subr.bf16.mxu0 %v2279_v8  ;;  %v2535_v8 = vld [vmem:[#allocation11 + $0x58] sm:$0xff]  }
 0x193   :  { %1678 = vmatpush3.bf16.msra.mxu1 %v2525_v5 }
 0x194   :  { %1679 = vmatprep.subr.bf16.mxu1 %v2529_v6 }
 0x195   :  { %1702 = vmatpush3.bf16.msra.mxu0 %v2285_v10  ;;  %v2541_v10 = vld [vmem:[#allocation11 + $0x60] sm:$0xff]  }
 0x196   :  { %1703 = vmatprep.subr.bf16.mxu0 %v2291_v12  ;;  %v2545_v12 = vld [vmem:[#allocation11 + $0x68] sm:$0xff]  }
 0x197   :  { %1680 = vmatpush3.bf16.msra.mxu1 %v2531_v7 }
 0x198   :  { %1681 = vmatprep.subr.bf16.mxu1 %v2535_v8 }
 0x199   :  { %1704 = vmatpush3.bf16.msra.mxu0 %v2297_v14  ;;  %v2552_v14 = vld [vmem:[#allocation11 + $0x70] sm:$0xff]  }
 0x19a   :  { %1705 = vmatprep.subr.bf16.mxu0 %v2303_v16  ;;  %v2558_v16 = vld [vmem:[#allocation11 + $0x78] sm:$0xff]  }
 0x19b   :  { %1682 = vmatpush3.bf16.msra.mxu1 %v2537_v9 }
 0x19c   :  { %1683 = vmatprep.subr.bf16.mxu1 %v2541_v10 }
 0x19d   :  { %1706 = vmatpush3.bf16.msra.mxu0 %v2309_v18  ;;  %v1158_v18 = vld [vmem:[#allocation5] sm:$0xff] }
 0x19e   :  { %1707 = vmatprep.subr.bf16.mxu0 %v2315_v20  ;;  %v1580_v19 = vcombine.high %v1158_v18, %v1158_v18  ;;  %v1579_v20 = vcombine.low %v1158_v18, %v1158_v18 }
 0x19f   :  { %1684 = vmatpush3.bf16.msra.mxu1 %v2543_v11 }
 0x1a0   :  { %1685 = vmatprep.subr.bf16.mxu1 %v2545_v12  ;;  %1222 = vmatprep.mubr.bf16.mxu0 %v1580_v19  ;;  %v1582_v19 = vcombine.high %v1159_v23, %v1159_v23 }
 0x1a1   :  { %1708 = vmatpush3.bf16.msra.mxu0 %v2321_v22 }
 0x1a2   :  { %1709 = vmatprep.subr.bf16.mxu0 %v2327_v24 }
 0x1a3   :  { %1686 = vmatpush3.bf16.msra.mxu1 %v2549_v13 }
 0x1a4   :  { %1687 = vmatprep.subr.bf16.mxu1 %v2552_v14 }
 0x1a5   :  { %1710 = vmatpush3.bf16.msra.mxu0 %v2333_v26  ;;  %v2763_v26 = vmov 0  }
 0x1a6   :  { %1711 = vmatprep.subr.bf16.mxu0 %v2339_v28  ;;  %v2765_v28 = vld [vmem:[#allocation51_spill] sm:$0xff] }
 0x1a7   :  { %1688 = vmatpush3.bf16.msra.mxu1 %v2555_v15 }
 0x1a8   :  { %1689 = vmatprep.subr.bf16.mxu1 %v2558_v16 }
 0x1a9   :  { %1712 = vmatpush3.bf16.msra.mxu0 %v2345_v30  ;;  %v2767_v30 = vld [vmem:[#allocation53_spill] sm:$0xff] }
 0x1aa   :  { %1741 = vmatprep.subr.bf16.mxu0 %v2352_v38  ;;  %v2769_v38 = vld [vmem:[#allocation55_spill] sm:$0xff] }
 0x1ab   :  { %1690 = vmatpush3.bf16.msra.mxu1 %v2561_v17 }
 0x1ac   :  { %1719 = vmatprep.subr.bf16.mxu1 %v2258_v1  ;;  %1223 = vmatmul.mubr.bf16.vlgmr.msra.gmra.mrb[12].mxu0 %v1579_v20  ;;  %v1160_v1 = vld [vmem:[#allocation5 + $0x10] sm:$0xff] }
 0x1ad   :  { %1742 = vmatpush3.bf16.msra.mxu0 %v2356_v40  ;;  %v1584_v22 = vcombine.high %v1160_v1, %v1160_v1  ;;  %v1583_v24 = vcombine.low %v1160_v1, %v1160_v1  ;;  %v2771_v40 = vld [vmem:[#allocation57_spill] sm:$0xff]  ;;  %v2772_v1 = vld [vmem:[#allocation19_spill] sm:$0xff] }
 0x1ae   :  { %1743 = vmatprep.subr.bf16.mxu0 %v2362_v42  ;;  %v865_v42 = vshrl.u32 %v864_v41, 7  ;;  %v2784_v41 = vld [vmem:[#allocation31_spill] sm:$0xff] }
 0x1af   :  { %1302 = vmatprep.mubr.bf16.mxu0 %v1584_v22  ;;  %v2773_v22 = vld [vmem:[#allocation20_spill] sm:$0xff] }
 0x1b0   :  { %v866_v43 = vsub.s32 0, %v865_v42  ;;  %v870_v45 = vsub.s32 1, %v865_v42  ;;  %v2785_v42 = vld [vmem:[#allocation32_spill] sm:$0xff] }
 0x1b1   :  { %1744 = vmatpush3.bf16.msra.mxu0 %v2369_v44  ;;  %v252_v44 = vld [vmem:[%s2680_s5] sm:$0x3] }
 0x1b2   :  { %1745 = vmatprep.subr.bf16.mxu0 %v2374_v46  ;;  %v2601_v46 = vrot.slane %v252_v44, %v866_v43  ;;  %v2603_v47 = vrot.slane %v252_v44, %v870_v45  ;;  %v1161_v43 = vld [vmem:[#allocation5 + $0x18] sm:$0xff]  ;;  %v1581_v44 = vcombine.low %v1159_v23, %v1159_v23  ;;  %v2786_v45 = vld [vmem:[#allocation33_spill] sm:$0xff] }
 0x1b5   :  { %1746 = vmatpush3.bf16.msra.mxu0 %v2381_v48 }
 0x1b6   :  { %1747 = vmatprep.subr.bf16.mxu0 %v2386_v50 }
 0x1b9   :  { %1748 = vmatpush3.bf16.msra.mxu0 %v2393_v52 }
 0x1ba   :  { %1749 = vmatprep.subr.bf16.mxu0 %v2398_v54 }
 0x1bd   :  { %1750 = vmatpush3.bf16.msra.mxu0 %v2405_v56 }
 0x1be   :  { %1751 = vmatprep.subr.bf16.mxu0 %v2410_v58 }
 0x1c1   :  { %1752 = vmatpush3.bf16.msra.mxu0 %v2417_v60 }
 0x1c2   :  { %1753 = vmatprep.subr.bf16.mxu0 %v2422_v62 }
 0x1c5   :  { %1754 = vmatpush3.bf16.msra.mxu0 %v2429_v32 }
 0x1c6   :  { %1755 = vmatprep.subr.bf16.mxu0 %v2434_v34 }
 0x1c9   :  { %1756 = vmatpush3.bf16.msra.mxu0 %v2441_v36 }
 0x1ca   :  { %1351 = vmatprep.subr.bf16.mxu0 %v2450_v51 }
 0x1cc   :  { %1303 = vmatmul.mubr.bf16.vlgmr.msra.gmra.mrb[16].mxu0 %v1583_v24  ;;  %v2774_v24 = vld [vmem:[#allocation21_spill] sm:$0xff] }
 0x1cd   :  { %1352 = vmatpush1.bf16.msra.mxu0 %v2448_v53  ;;  %1383 = vmatprep.mubr.bf16.mxu0 %v2763_v26  ;;  %v2775_v26 = vld [vmem:[#allocation22_spill] sm:$0xff] }
 0x1ce   :  { %1353 = vmatprep.subr.bf16.mxu0 %v2452_v35 }
 0x1d1   :  { %1354 = vmatpush1.bf16.msra.mxu0 %v2456_v61 }
 0x1d2   :  { %1355 = vmatprep.subr.bf16.mxu0 %v2459_v37 }
 0x1d5   :  { %1356 = vmatpush1.bf16.msra.mxu0 %v2462_v57 }
 0x1d6   :  { %1357 = vmatprep.subr.bf16.mxu0 %v2465_v55 }
 0x1d9   :  { %1358 = vmatpush1.bf16.msra.mxu0 %v2468_v59 }
 0x1da   :  { %1359 = vmatprep.subr.bf16.mxu0 %v2764_v27  ;;  %v2776_v27 = vld [vmem:[#allocation23_spill] sm:$0xff] }
 0x1dd   :  { %1360 = vmatpush1.bf16.msra.mxu0 %v2765_v28  ;;  %v2777_v28 = vld [vmem:[#allocation24_spill] sm:$0xff] }
 0x1de   :  { %1361 = vmatprep.subr.bf16.mxu0 %v2766_v29  ;;  %v2778_v29 = vld [vmem:[#allocation25_spill] sm:$0xff] }
 0x1e1   :  { %1362 = vmatpush1.bf16.msra.mxu0 %v2767_v30  ;;  %v2779_v30 = vld [vmem:[#allocation26_spill] sm:$0xff] }
 0x1e2   :  { %1363 = vmatprep.subr.bf16.mxu0 %v2768_v31  ;;  %v2780_v31 = vld [vmem:[#allocation27_spill] sm:$0xff] }
 0x1e5   :  { %1364 = vmatpush1.bf16.msra.mxu0 %v2769_v38  ;;  %v2781_v38 = vld [vmem:[#allocation28_spill] sm:$0xff] }
 0x1e6   :  { %1365 = vmatprep.subr.bf16.mxu0 %v2770_v39  ;;  %v2782_v39 = vld [vmem:[#allocation29_spill] sm:$0xff] }
 0x1e9   :  { %1366 = vmatpush1.bf16.msra.mxu0 %v2771_v40  ;;  %v2783_v40 = vld [vmem:[#allocation30_spill] sm:$0xff] }
 0x25f   :  { %v988_v48 = vpop.f32.mrb[8].mxu0 }
 0x260   :  { %v989_v49 = vadd.f32 %v988_v48, %v2601_v46  ;;  %v990_v50 = vpop.f32.mrb[9].mxu0  ;;  %v1586_v48 = vcombine.high %v1161_v43, %v1161_v43 }
 0x261   :  { %v991_v51 = vadd.f32 %v990_v50, %v2603_v47  ;;  %v992_v52 = vpop.f32.mrb[10].mxu0  ;;  %v2788_v50 = vld [vmem:[#allocation35_spill] sm:$0xff] }
 0x262   :  { %v995_v53 = vmul.f32 %v989_v49, %v989_v49  ;;  %v993_v54 = vpop.f32.mrb[11].mxu0  ;;  %v2790_v52 = vld [vmem:[#allocation37_spill] sm:$0xff] }
 0x263   :  { %v996_v56 = vmul.f32 %v991_v51, %v991_v51  ;;  %v2792_v54 = vld [vmem:[#allocation39_spill] sm:$0xff] }
 0x264   :  { %v997_v58 = vmul.f32 %v995_v53, %v989_v49  ;;  %v2791_v53 = vld [vmem:[#allocation38_spill] sm:$0xff] }
 0x265   :  { %v998_v60 = vmul.f32 %v996_v56, %v991_v51  ;;  %v2793_v56 = vld [vmem:[#allocation40_spill] sm:$0xff] }
 0x266   :  { %v999_v62 = vmul.f32 0.044715, %v997_v58  ;;  %v2794_v58 = vld [vmem:[#allocation41_spill] sm:$0xff] }
 0x267   :  { %v1000_v32 = vmul.f32 0.044715, %v998_v60  ;;  %v2795_v60 = vld [vmem:[#allocation42_spill] sm:$0xff] }
 0x268   :  { %v1001_v34 = vadd.f32 %v999_v62, %v989_v49  ;;  %v2796_v62 = vld [vmem:[#allocation43_spill] sm:$0xff] }
 0x269   :  { %v1002_v35 = vadd.f32 %v1000_v32, %v991_v51  ;;  %v2797_v32 = vld [vmem:[#allocation44_spill] sm:$0xff] }
 0x26a   :  { %v1003_v36 = vmul.f32 0.7978846, %v1001_v34  ;;  %v2798_v34 = vld [vmem:[#allocation45_spill] sm:$0xff] }
 0x26b   :  { %v1004_v37 = vmul.f32 0.7978846, %v1002_v35  ;;  %v2799_v35 = vld [vmem:[#allocation46_spill] sm:$0xff] }
 0x26c   :  { %1939 = vtanh.f32 %v1003_v36  ;;  %v2800_v36 = vld [vmem:[#allocation47_spill] sm:$0xff] }
 0x26d   :  { %1941 = vtanh.f32 %v1004_v37  ;;  %v2801_v37 = vld [vmem:[#allocation48_spill] sm:$0xff] }
 0x276   :  { %v1940_v61 = vpop.eup %1939 }
 0x277   :  { %v1942_v57 = vpop.eup %1941  ;;  %v1007_v55 = vadd.f32 1.0, %v1940_v61  ;;  %v1585_v61 = vcombine.low %v1161_v43, %v1161_v43 }
 0x278   :  { %v1008_v59 = vadd.f32 1.0, %v1942_v57  ;;  %v2802_v57 = vld [vmem:[#allocation49_spill] sm:$0xff] }
 0x279   :  { %v1009_v63 = vmul.f32 0.5, %v1007_v55 }
 0x27a   :  { %v1010_v33 = vmul.f32 0.5, %v1008_v59 }
 0x27b   :  { %v1011_v0 = vmul.f32 %v1009_v63, %v989_v49  ;;  %v2787_v49 = vld [vmem:[#allocation34_spill] sm:$0xff] }
 0x27c   :  { %v1012_v21 = vmul.f32 %v1010_v33, %v991_v51  ;;  %v2789_v51 = vld [vmem:[#allocation36_spill] sm:$0xff] }
 0x27d   :  { %v1013_v20 = vpack.c.bf16 %v1011_v0, %v1011_v0 }
 0x27e   :  { %v1014_v18 = vpack.c.bf16 %v1012_v21, %v1012_v21 }
 0x280   :  { %1149 = vmatprep.mubr.bf16.mxu1 %v1014_v18 }
 0x281   :  { %1150 = vmatmul.mubr.bf16.vlgmr.msra.gmra.mrb[8].mxu1 %v1013_v20 }
 0x282   :  { %1720 = vmatpush3.bf16.msra.mxu1 %v2772_v1  ;;  %1262 = vmatprep.mubr.bf16.mxu1 %v1582_v19 }
 0x283   :  { %1721 = vmatprep.subr.bf16.mxu1 %v2773_v22 }
 0x286   :  { %1722 = vmatpush3.bf16.msra.mxu1 %v2774_v24 }
 0x287   :  { %1723 = vmatprep.subr.bf16.mxu1 %v2775_v26 }
 0x28a   :  { %1724 = vmatpush3.bf16.msra.mxu1 %v2776_v27 }
 0x28b   :  { %1725 = vmatprep.subr.bf16.mxu1 %v2777_v28 }
 0x28e   :  { %1726 = vmatpush3.bf16.msra.mxu1 %v2778_v29 }
 0x28f   :  { %1727 = vmatprep.subr.bf16.mxu1 %v2779_v30 }
 0x292   :  { %1728 = vmatpush3.bf16.msra.mxu1 %v2780_v31 }
 0x293   :  { %1729 = vmatprep.subr.bf16.mxu1 %v2781_v38 }
 0x296   :  { %1730 = vmatpush3.bf16.msra.mxu1 %v2782_v39 }
 0x297   :  { %1731 = vmatprep.subr.bf16.mxu1 %v2783_v40 }
 0x29a   :  { %1732 = vmatpush3.bf16.msra.mxu1 %v2784_v41 }
 0x29b   :  { %1733 = vmatprep.subr.bf16.mxu1 %v2785_v42 }
 0x29e   :  { %1734 = vmatpush3.bf16.msra.mxu1 %v2786_v45 }
 0x29f   :  { %1763 = vmatprep.subr.bf16.mxu1 %v2787_v49 }
 0x2a1   :  { %1263 = vmatmul.mubr.bf16.vlgmr.msra.gmra.mrb[12].mxu1 %v1581_v44 }
 0x2a2   :  { %1764 = vmatpush3.bf16.msra.mxu1 %v2788_v50  ;;  %1342 = vmatprep.mubr.bf16.mxu1 %v1586_v48 }
 0x2a3   :  { %1765 = vmatprep.subr.bf16.mxu1 %v2789_v51 }
 0x2a6   :  { %1766 = vmatpush3.bf16.msra.mxu1 %v2790_v52 }
 0x2a7   :  { %1767 = vmatprep.subr.bf16.mxu1 %v2791_v53 }
 0x2aa   :  { %1768 = vmatpush3.bf16.msra.mxu1 %v2792_v54 }
 0x2ab   :  { %1769 = vmatprep.subr.bf16.mxu1 %v2793_v56 }
 0x2ae   :  { %1770 = vmatpush3.bf16.msra.mxu1 %v2794_v58 }
 0x2af   :  { %1771 = vmatprep.subr.bf16.mxu1 %v2795_v60 }
 0x2b2   :  { %1772 = vmatpush3.bf16.msra.mxu1 %v2796_v62 }
 0x2b3   :  { %1773 = vmatprep.subr.bf16.mxu1 %v2797_v32 }
 0x2b6   :  { %1774 = vmatpush3.bf16.msra.mxu1 %v2798_v34 }
 0x2b7   :  { %1775 = vmatprep.subr.bf16.mxu1 %v2799_v35 }
 0x2ba   :  { %1776 = vmatpush3.bf16.msra.mxu1 %v2800_v36 }
 0x2bb   :  { %1777 = vmatprep.subr.bf16.mxu1 %v2801_v37 }
 0x2be   :  { %1778 = vmatpush3.bf16.msra.mxu1 %v2802_v57 }
 0x2bf   :  { %1785 = vmatprep.subr.bf16.mxu1 %v2517_v2  ;;  %v1713_v2 = vpop.f32.mrb[12].mxu0 }
 0x2c1   :  { %1343 = vmatmul.mubr.bf16.vlgmr.msra.gmra.mrb[16].mxu1 %v1585_v61 }
 0x2c2   :  { %1786 = vmatpush3.bf16.msra.mxu1 %v2519_v3  ;;  %v1714_v3 = vpop.f32.mrb[13].mxu0 }
 0x2c3   :  { %1787 = vmatprep.subr.bf16.mxu1 %v2523_v4  ;;  %v1715_v4 = vadd.f32 %v1714_v3, %v1713_v2 }
 0x2c5   :  { %v1225_v63 = vadd.f32 %v1715_v4, %v2498_v25 }
 0x2c6   :  { %1788 = vmatpush3.bf16.msra.mxu1 %v2525_v5  ;;  %v1716_v5 = vpop.f32.mrb[14].mxu0 }
 0x2c7   :  { %1789 = vmatprep.subr.bf16.mxu1 %v2529_v6  ;;  %v1717_v6 = vpop.f32.mrb[15].mxu0 }
 0x2ca   :  { %1790 = vmatpush3.bf16.msra.mxu1 %v2531_v7  ;;  %v1757_v7 = vpop.f32.mrb[16].mxu0 }
 0x2cb   :  { %1791 = vmatprep.subr.bf16.mxu1 %v2535_v8  ;;  %v1758_v8 = vpop.f32.mrb[17].mxu0 }
 0x2ce   :  { %1792 = vmatpush3.bf16.msra.mxu1 %v2537_v9  ;;  %v1759_v9 = vadd.f32 %v1758_v8, %v1757_v7 }
 0x2cf   :  { %1793 = vmatprep.subr.bf16.mxu1 %v2541_v10  ;;  %v1760_v10 = vpop.f32.mrb[18].mxu0 }
 0x2d2   :  { %1794 = vmatpush3.bf16.msra.mxu1 %v2543_v11  ;;  %v1761_v11 = vpop.f32.mrb[19].mxu0 }
 0x2d3   :  { %1795 = vmatprep.subr.bf16.mxu1 %v2545_v12 }
 0x2d6   :  { %1796 = vmatpush3.bf16.msra.mxu1 %v2549_v13  ;;  %v1562_v13 = vld [vmem:[%s2682_s7] ss:$0 sm:$0xff]  ;;  %s2122_s7 = smov [#allocation13]  }
 0x2d7   :  { %1797 = vmatprep.subr.bf16.mxu1 %v2552_v14  ;;  %s1459_s11 = sshll.u32 %s2122_s7, 4  ;;  %s1460_s11 = int_to_ptr.vmem [resolvable:$true] %s1459_s11 }
 0x2d8   :  { %s2079_s13 = scalar_lea.vmem %s1460_s11, 256  ;;  %p2084_p7 = scmp.lt.s32.totalorder %s1460_s11, %s1460_s11 }
 0x2d9   :  { %p2080_p6 = scmp.ne.s32.totalorder %s1460_s11, %s2079_s13  ;;  %p2085_p8 = scmp.lt.s32.totalorder %s2079_s13, %s2079_s13 }
 0x2da   :  { %1798 = vmatpush3.bf16.msra.mxu1 %v2555_v15 }
 0x2db   :  { %1799 = vmatprep.subr.bf16.mxu1 %v2558_v16  ;;  %p2086_p9 = por %p2085_p8, %p2084_p7 }
 0x2dd   :  { %p2087_p10 = pnand %p2086_p9, %p2080_p6 }
 0x2de   :  { %1800 = vmatpush3.bf16.msra.mxu1 %v2561_v17 }
 0x354   :  { %v1691_v12 = vpop.f32.mrb[8].mxu1 }
 0x355   :  { %v1692_v14 = vpop.f32.mrb[9].mxu1 }
 0x356   :  { %v1693_v15 = vadd.f32 %v1692_v14, %v1691_v12  ;;  %v1694_v55 = vpop.f32.mrb[10].mxu1 }
 0x357   :  { %v1695_v59 = vpop.f32.mrb[11].mxu1 }
 0x358   :  { %v1152_v16 = vadd.f32 %v1693_v15, %v1562_v13 }
 0x35a   :  { %1157 = vst [vmem:[#allocation13] sm:$0xff] %v1152_v16 }
 0x374   :  { %v1735_v33 = vpop.f32.mrb[12].mxu1 }
 0x375   :  { %v1736_v17 = vpop.f32.mrb[13].mxu1 }
 0x376   :  { %v1737_v0 = vadd.f32 %v1736_v17, %v1735_v33  ;;  %v1738_v23 = vpop.f32.mrb[14].mxu1 }
 0x377   :  { %v1739_v21 = vpop.f32.mrb[15].mxu1 }
 0x378   :  { %v1265_v18 = vadd.f32 %v1737_v0, %v1225_v63 }
 0x37a   :  { %v1305_v19 = vadd.f32 %v1759_v9, %v1265_v18 }
 0x394   :  { %v1779_v20 = vpop.f32.mrb[16].mxu1 }
 0x395   :  { %v1780_v1 = vpop.f32.mrb[17].mxu1 }
 0x396   :  { %v1781_v22 = vadd.f32 %v1780_v1, %v1779_v20  ;;  %v1782_v24 = vpop.f32.mrb[18].mxu1 }
 0x397   :  { %v1783_v26 = vpop.f32.mrb[19].mxu1 }
 0x398   :  { %v1345_v27 = vadd.f32 %v1781_v22, %v1305_v19 }
 0x39a   :  { %v1350_v28 = vpack.c.bf16 %v1345_v27, %v1345_v27 }
 0x39c   :  { %1384 = vmatmul.mubr.bf16.vlgmr.msra.gmra.mrb[20].mxu0 %v1350_v28 }
 0x46f   :  { %v1385_v29 = vpop.f32.mrb[20].mxu0 }
 0x470   :  { %v1386_v30 = vadd.f32 %v1385_v29, %v2601_v46  ;;  %v1387_v31 = vpop.f32.mrb[21].mxu0 }
 0x471   :  { %v1388_v25 = vadd.f32 %v1387_v31, %v2603_v47  ;;  %v1389_v38 = vpop.f32.mrb[22].mxu0 }
 0x472   :  { %v1392_v39 = vmul.f32 %v1386_v30, %v1386_v30  ;;  %v1390_v40 = vpop.f32.mrb[23].mxu0 }
 0x473   :  { %v1393_v41 = vmul.f32 %v1388_v25, %v1388_v25 }
 0x474   :  { %v1394_v42 = vmul.f32 %v1392_v39, %v1386_v30 }
 0x475   :  { %v1395_v43 = vmul.f32 %v1393_v41, %v1388_v25 }
 0x476   :  { %v1396_v44 = vmul.f32 0.044715, %v1394_v42 }
 0x477   :  { %v1397_v45 = vmul.f32 0.044715, %v1395_v43 }
 0x478   :  { %v1398_v48 = vadd.f32 %v1396_v44, %v1386_v30 }
 0x479   :  { %v1399_v49 = vadd.f32 %v1397_v45, %v1388_v25 }
 0x47a   :  { %v1400_v50 = vmul.f32 0.7978846, %v1398_v48 }
 0x47b   :  { %v1401_v51 = vmul.f32 0.7978846, %v1399_v49 }
 0x47c   :  { %1943 = vtanh.f32 %v1400_v50 }
 0x47d   :  { %1945 = vtanh.f32 %v1401_v51 }
 0x486   :  { %v1944_v52 = vpop.eup %1943 }
 0x487   :  { %v1946_v53 = vpop.eup %1945  ;;  %v1404_v46 = vadd.f32 1.0, %v1944_v52 }
 0x488   :  { %v1405_v54 = vadd.f32 1.0, %v1946_v53 }
 0x489   :  { %v1406_v56 = vmul.f32 0.5, %v1404_v46 }
 0x48a   :  { %v1407_v47 = vmul.f32 0.5, %v1405_v54 }
 0x48b   :  { %v1408_v58 = vmul.f32 %v1406_v56, %v1386_v30 }
 0x48c   :  { %v1409_v60 = vmul.f32 %v1407_v47, %v1388_v25 }
 0x48d   :  { %v1410_v32 = vpack.c.bf16 %v1408_v58, %v1408_v58 }
 0x48e   :  { %v1411_v62 = vpack.c.bf16 %v1409_v60, %v1409_v60 }
 0x490   :  { %1444 = vmatprep.mubr.bf16.mxu1 %v1411_v62 }
 0x491   :  { %1445 = vmatmul.mubr.bf16.vlgmr.msra.gmra.mrb[20].mxu1 %v1410_v32 }
 0x564   :  { %v1801_v34 = vpop.f32.mrb[20].mxu1 }
 0x565   :  { %v1802_v35 = vpop.f32.mrb[21].mxu1 }
 0x566   :  { %v1803_v36 = vadd.f32 %v1802_v35, %v1801_v34  ;;  %v1804_v37 = vpop.f32.mrb[22].mxu1 }
 0x567   :  { %v1805_v61 = vpop.f32.mrb[23].mxu1 }
 0x568   :  { %v1447_v57 = vadd.f32 %v1803_v36, %v1562_v13 }
 0x56a   :  { %1453 = vst [vmem:[#allocation13 + $0x8] sm:$0xff] %v1447_v57 }
 0x56b   :  { %2090 = shalt.err (!%p2087_p10)
}
 0x56c   :  { %s2091_s16 = scalar_lea.hbm %s2683_s8, 256 }
 0x56d   :  { %p2092_p11 = scmp.ne.s32.totalorder %s2683_s8, %s2091_s16  ;;  %p2095_p12 = scmp.lt.u32.totalorder %s2091_s16, %s2683_s8 }
 0x56f   :  { %p2097_p13 = pnand %p2095_p12, %p2092_p11 }
 0x571   :  { %2100 = shalt.err (!%p2097_p13)
}
 0x572   :  { %1465 = dma.vmem_to_hbm [thread:$0]  %s1460_s11, 256, %s2683_s8, [#allocation4], %s2118_s2, %s2118_s2, %s2119_s12  }
 0x573   :  { %2109 = dma.done.wait [#allocation4], 256  }
 0x574   :  { %2110 = vsyncadd [#allocation4], 4294967040 }
 0x575   :  { %1469 = vsyncpa [#allocation3], 1 }
 0x576   :  { %1470 = vsyncpa [#allocation6], 1 }
 0x577   :  { %1471 = vsyncpa [#allocation9], 1 }
 0x578   :  { %1472 = vsyncpa [#allocation12], 1 }
 0x579   :  { %1473 = vsyncpa [#allocation4], 1 }

</bundles_post_ra>
